<compile_context>
chip_gen: v7x
topology: tpu7x:2x2x1
jax: 0.10.0
libtpu: 0.0.40
codegen_flags: <defaults>
</compile_context>

<pallas_src>
import functools

import jax
import jax.numpy as jnp
from jax.experimental import pallas as pl
from jax.experimental.pallas import tpu as pltpu

EPS = 1e-5


def encoder_kernel(x_ref, w1b_ref, w2b_ref, g1_ref, be1_ref, g2_ref, be2_ref,
                   out_ref, *, N, H, W, Cout):
    NH = N * H
    WCo = W * Cout
    cnt_inv = 1.0 / float(NH * W)          # BN count = N*H*W per channel

    # Channel-summing matrix, built in-kernel (no HBM operand): lane j collects
    # every lane with the same channel index (lane layout is w-major: w*Cout + c).
    ci = jax.lax.broadcasted_iota(jnp.int32, (WCo, WCo), 0) % Cout
    cj = jax.lax.broadcasted_iota(jnp.int32, (WCo, WCo), 1) % Cout
    tsum = (ci == cj).astype(jnp.float32)

    # Row-position masks: realize the H zero-padding and batch boundaries for the
    # rolled kh taps (computed once, shared by both convs).
    h_in_img = jax.lax.broadcasted_iota(jnp.int32, (NH, WCo), 0) % H
    not_top = h_in_img != 0            # kh=0 tap reads row h-1: invalid at h == 0
    not_bot = h_in_img != (H - 1)      # kh=2 tap reads row h+1: invalid at h == H-1

    def conv_bn_relu(x2d, band_ref, g_ref, b_ref):
        # 3x3 conv as ONE MXU matmul; kh taps land in lane blocks of width WCo.
        full = jnp.dot(x2d, band_ref[...], preferred_element_type=jnp.float32)
        blk0 = full[:, 0 * WCo:1 * WCo]        # 128-aligned lane slices
        blk1 = full[:, 1 * WCo:2 * WCo]
        blk2 = full[:, 2 * WCo:3 * WCo]
        # Vertical taps via sublane rolls (XLU) + masks: out[h] = blk1[h]
        #   + blk0[h-1] (zero at top of each image) + blk2[h+1] (zero at bottom).
        acc = (blk1
               + jnp.where(not_top, pltpu.roll(blk0, 1, axis=0), 0.0)
               + jnp.where(not_bot, pltpu.roll(blk2, NH - 1, axis=0), 0.0))

        # Train-mode BN (batch stats over N,H,W per channel) as one fused affine,
        # then ReLU.  All stats kept in f32 (single-pass E[x^2] - mean^2).
        s = jnp.sum(acc, axis=0, keepdims=True)            # per-(w,c) column sums
        q = jnp.sum(acc * acc, axis=0, keepdims=True)
        mean = jnp.dot(s, tsum, preferred_element_type=jnp.float32) * cnt_inv
        var = jnp.dot(q, tsum, preferred_element_type=jnp.float32) * cnt_inv - mean * mean
        a = jax.lax.rsqrt(var + EPS) * g_ref[...]
        c = b_ref[...] - mean * a
        return jnp.maximum(acc * a + c, 0.0)

    # conv1+BN1+ReLU feeds conv2+BN2+ReLU directly; single full-width output store.
    y1 = conv_bn_relu(x_ref[...], w1b_ref, g1_ref, be1_ref)
    out_ref[...] = conv_bn_relu(y1, w2b_ref, g2_ref, be2_ref)


def _band_weights(w_hwio, W):
    """(3,3,Cin,Cout) HWIO -> (W*Cin, 3*W*Cout) banded matrix.

    Column block kh holds, for output position w / channel co, the kw taps placed
    at input position w+kw-1; positions outside [0,W) have no row, which realizes
    the zero padding along W implicitly."""
    _, _, cin, cout = w_hwio.shape
    shift = jnp.stack([jnp.eye(W, k=1 - kw, dtype=jnp.float32) for kw in range(3)])  # (3,W,W)
    band = jnp.einsum('hkio,kuv->huivo', w_hwio.astype(jnp.float32), shift)  # (3,W,Cin,W,Cout)
    band = band.reshape(3, W * cin, W * cout)
    return jnp.concatenate([band[0], band[1], band[2]], axis=1)   # (W*Cin, 3*W*Cout)


def prepare_encoder_params(params, W):
    """One-time weight prep (NOT per forward call): banded conv matrices and
    lane-tiled BN affine parameters.  Conv biases are unused (cancelled exactly
    by training-mode BN mean subtraction)."""
    w1, _b1, g1, be1, w2, _b2, g2, be2 = params

    def lane(v):                                  # (C,) -> (1, W*C), lane = w*C + c
        return jnp.tile(v.astype(jnp.float32).reshape(1, -1), (1, W))

    return (_band_weights(w1, W), _band_weights(w2, W),
            lane(g1), lane(be1), lane(g2), lane(be2))


@jax.jit
def encoder_forward(x_nchw, prepped):
    """x_nchw: (N, Cin, H, W) float32. Returns (N, Cout, H, W) float32."""
    w1b, w2b, g1l, be1l, g2l, be2l = prepped
    N, Cin, H, W = x_nchw.shape
    Cout = g1l.shape[1] // W

    # TODO(synk): the NCHW<->NHWC transposes cost an HBM round trip each; a
    # NHWC-native caller (or a gridded BlockSpec relayout) would remove them.
    x2d = jnp.transpose(x_nchw, (0, 2, 3, 1)).astype(jnp.float32).reshape(N * H, W * Cin)

    kernel = functools.partial(encoder_kernel, N=N, H=H, W=W, Cout=Cout)
    vmem = pl.BlockSpec(memory_space=pltpu.MemorySpace.VMEM)

    out2d = pl.pallas_call(
        kernel,
        out_shape=jax.ShapeDtypeStruct((N * H, W * Cout), jnp.float32),
        in_specs=[vmem] * 7,
        out_specs=vmem,
    )(x2d, w1b, w2b, g1l, be1l, g2l, be2l)

    return jnp.transpose(out2d.reshape(N, H, W, Cout), (0, 3, 1, 2))  # back to NCHW


def _reference_forward(x_nchw, params):
    """Pure-JAX reference (lax conv + train-mode BN), faithful to the PyTorch module."""
    w1, b1, g1, be1, w2, b2, g2, be2 = params
    x = jnp.transpose(x_nchw, (0, 2, 3, 1)).astype(jnp.float32)  # NHWC
    dn = jax.lax.conv_dimension_numbers(x.shape, w1.shape, ('NHWC', 'HWIO', 'NHWC'))

    def block(x, w, b, g, be):
        y = jax.lax.conv_general_dilated(x, w, (1, 1), 'SAME', dimension_numbers=dn) + b
        mean = jnp.mean(y, axis=(0, 1, 2), keepdims=True)
        var = jnp.mean((y - mean) ** 2, axis=(0, 1, 2), keepdims=True)
        y = (y - mean) * jax.lax.rsqrt(var + EPS) * g + be
        return jnp.maximum(y, 0.0)

    y = block(x, w1, b1, g1, be1)
    y = block(y, w2, b2, g2, be2)
    return jnp.transpose(y, (0, 3, 1, 2))


def init_params(key, in_c, out_c):
    ks = jax.random.split(key, 4)
    scale1 = 1.0 / jnp.sqrt(in_c * 9.0)
    scale2 = 1.0 / jnp.sqrt(out_c * 9.0)
    w1 = jax.random.normal(ks[0], (3, 3, in_c, out_c), jnp.float32) * scale1
    b1 = jax.random.normal(ks[1], (out_c,), jnp.float32) * 0.1
    w2 = jax.random.normal(ks[2], (3, 3, out_c, out_c), jnp.float32) * scale2
    b2 = jax.random.normal(ks[3], (out_c,), jnp.float32) * 0.1
    g1 = jnp.ones((out_c,), jnp.float32)
    be1 = jnp.zeros((out_c,), jnp.float32)
    g2 = jnp.ones((out_c,), jnp.float32)
    be2 = jnp.zeros((out_c,), jnp.float32)
    return (w1, b1, g1, be1, w2, b2, g2, be2)


if __name__ == "__main__":
    key = jax.random.PRNGKey(0)
    k_x, k_p = jax.random.split(key)

    N, Cin, Cout, H, W = 2, 4, 8, 16, 16
    x = jax.random.normal(k_x, (N, Cin, H, W), jnp.float32)
    params = init_params(k_p, Cin, Cout)
    prepped = prepare_encoder_params(params, W)      # one-time weight prep

    out = jax.block_until_ready(encoder_forward(x, prepped))
    ref = jax.block_until_ready(_reference_forward(x, params))

    assert out.shape == (N, Cout, H, W)
    assert jnp.allclose(out, ref, atol=1e-4, rtol=1e-4), \
        f"max abs diff {jnp.max(jnp.abs(out - ref))}"
    print("KERNEL_OK")
</pallas_src>

<mosaic_0001>
module attributes {stable_mosaic.version = 11 : i64} {
  func.func @encoder_kernel(%arg0: memref<32x64xf32, #tpu.memory_space<vmem>>, %arg1: memref<64x384xf32, #tpu.memory_space<vmem>>, %arg2: memref<128x384xf32, #tpu.memory_space<vmem>>, %arg3: memref<1x128xf32, #tpu.memory_space<vmem>>, %arg4: memref<1x128xf32, #tpu.memory_space<vmem>>, %arg5: memref<1x128xf32, #tpu.memory_space<vmem>>, %arg6: memref<1x128xf32, #tpu.memory_space<vmem>>, %arg7: memref<32x128xf32, #tpu.memory_space<vmem>>) attributes {dimension_semantics = [], scalar_prefetch = 0 : i64, scratch_operands = 0 : i64, tpu.core_type = #tpu.core_type<tc>} {
    %0 = tpu.iota {dimensions = array<i32: 0>} : vector<128x128xi32>
    %c8_i32 = arith.constant 8 : i32
    %c0_i32 = arith.constant 0 : i32
    %1 = arith.cmpi eq, %c8_i32, %c0_i32 : i32
    %c1_i32 = arith.constant 1 : i32
    %2 = arith.select %1, %c1_i32, %c8_i32 : i32
    %3 = vector.broadcast %2 : i32 to vector<128x128xi32>
    %4 = arith.remsi %0, %3 : vector<128x128xi32>
    %c0_i32_0 = arith.constant 0 : i32
    %5 = vector.broadcast %c0_i32_0 : i32 to vector<128x128xi32>
    %6 = arith.cmpi ne, %4, %5 : vector<128x128xi32>
    %c0_i32_1 = arith.constant 0 : i32
    %7 = vector.broadcast %c0_i32_1 : i32 to vector<128x128xi32>
    %8 = arith.cmpi slt, %4, %7 : vector<128x128xi32>
    %c0_i32_2 = arith.constant 0 : i32
    %9 = arith.cmpi slt, %2, %c0_i32_2 : i32
    %10 = vector.broadcast %9 : i1 to vector<128x128xi1>
    %11 = vector.broadcast %10 : vector<128x128xi1> to vector<128x128xi1>
    %12 = arith.xori %8, %11 : vector<128x128xi1>
    %13 = arith.andi %12, %6 : vector<128x128xi1>
    %14 = vector.broadcast %2 : i32 to vector<128x128xi32>
    %15 = arith.addi %4, %14 : vector<128x128xi32>
    %16 = arith.select %13, %15, %4 : vector<128x128xi1>, vector<128x128xi32>
    %17 = tpu.iota {dimensions = array<i32: 1>} : vector<128x128xi32>
    %c8_i32_3 = arith.constant 8 : i32
    %c0_i32_4 = arith.constant 0 : i32
    %18 = arith.cmpi eq, %c8_i32_3, %c0_i32_4 : i32
    %c1_i32_5 = arith.constant 1 : i32
    %19 = arith.select %18, %c1_i32_5, %c8_i32_3 : i32
    %20 = vector.broadcast %19 : i32 to vector<128x128xi32>
    %21 = arith.remsi %17, %20 : vector<128x128xi32>
    %c0_i32_6 = arith.constant 0 : i32
    %22 = vector.broadcast %c0_i32_6 : i32 to vector<128x128xi32>
    %23 = arith.cmpi ne, %21, %22 : vector<128x128xi32>
    %c0_i32_7 = arith.constant 0 : i32
    %24 = vector.broadcast %c0_i32_7 : i32 to vector<128x128xi32>
    %25 = arith.cmpi slt, %21, %24 : vector<128x128xi32>
    %c0_i32_8 = arith.constant 0 : i32
    %26 = arith.cmpi slt, %19, %c0_i32_8 : i32
    %27 = vector.broadcast %26 : i1 to vector<128x128xi1>
    %28 = vector.broadcast %27 : vector<128x128xi1> to vector<128x128xi1>
    %29 = arith.xori %25, %28 : vector<128x128xi1>
    %30 = arith.andi %29, %23 : vector<128x128xi1>
    %31 = vector.broadcast %19 : i32 to vector<128x128xi32>
    %32 = arith.addi %21, %31 : vector<128x128xi32>
    %33 = arith.select %30, %32, %21 : vector<128x128xi1>, vector<128x128xi32>
    %34 = arith.cmpi eq, %16, %33 : vector<128x128xi32>
    %35 = arith.extui %34 : vector<128x128xi1> to vector<128x128xi32>
    %36 = arith.sitofp %35 : vector<128x128xi32> to vector<128x128xf32>
    %37 = tpu.iota {dimensions = array<i32: 0>} : vector<32x128xi32>
    %c16_i32 = arith.constant 16 : i32
    %c0_i32_9 = arith.constant 0 : i32
    %38 = arith.cmpi eq, %c16_i32, %c0_i32_9 : i32
    %c1_i32_10 = arith.constant 1 : i32
    %39 = arith.select %38, %c1_i32_10, %c16_i32 : i32
    %40 = vector.broadcast %39 : i32 to vector<32x128xi32>
    %41 = arith.remsi %37, %40 : vector<32x128xi32>
    %c0_i32_11 = arith.constant 0 : i32
    %42 = vector.broadcast %c0_i32_11 : i32 to vector<32x128xi32>
    %43 = arith.cmpi ne, %41, %42 : vector<32x128xi32>
    %c0_i32_12 = arith.constant 0 : i32
    %44 = vector.broadcast %c0_i32_12 : i32 to vector<32x128xi32>
    %45 = arith.cmpi slt, %41, %44 : vector<32x128xi32>
    %c0_i32_13 = arith.constant 0 : i32
    %46 = arith.cmpi slt, %39, %c0_i32_13 : i32
    %47 = vector.broadcast %46 : i1 to vector<32x128xi1>
    %48 = vector.broadcast %47 : vector<32x128xi1> to vector<32x128xi1>
    %49 = arith.xori %45, %48 : vector<32x128xi1>
    %50 = arith.andi %49, %43 : vector<32x128xi1>
    %51 = vector.broadcast %39 : i32 to vector<32x128xi32>
    %52 = arith.addi %41, %51 : vector<32x128xi32>
    %53 = arith.select %50, %52, %41 : vector<32x128xi1>, vector<32x128xi32>
    %c0_i32_14 = arith.constant 0 : i32
    %54 = vector.broadcast %c0_i32_14 : i32 to vector<32x128xi32>
    %55 = arith.cmpi ne, %53, %54 : vector<32x128xi32>
    %c15_i32 = arith.constant 15 : i32
    %56 = vector.broadcast %c15_i32 : i32 to vector<32x128xi32>
    %57 = arith.cmpi ne, %53, %56 : vector<32x128xi32>
    %c0 = arith.constant 0 : index
    %c0_15 = arith.constant 0 : index
    %58 = vector.load %arg0[%c0, %c0_15] : memref<32x64xf32, #tpu.memory_space<vmem>>, vector<32x64xf32>
    %c0_16 = arith.constant 0 : index
    %c0_17 = arith.constant 0 : index
    %59 = vector.load %arg1[%c0_16, %c0_17] : memref<64x384xf32, #tpu.memory_space<vmem>>, vector<64x384xf32>
    %cst = arith.constant dense<0.000000e+00> : vector<32x384xf32>
    %60 = tpu.matmul %58, %59, %cst {dimension_numbers = #tpu.dot_dimension_numbers<[1], [0], [0], [1], [0, 0, 1, 1], [], []>} : vector<32x64xf32>, vector<64x384xf32>, vector<32x384xf32> -> vector<32x384xf32>
    %61 = vector.extract_strided_slice %60 {offsets = [0, 0], sizes = [32, 128], strides = [1, 1]} : vector<32x384xf32> to vector<32x128xf32>
    %62 = vector.extract_strided_slice %60 {offsets = [0, 128], sizes = [32, 128], strides = [1, 1]} : vector<32x384xf32> to vector<32x128xf32>
    %63 = vector.extract_strided_slice %60 {offsets = [0, 256], sizes = [32, 128], strides = [1, 1]} : vector<32x384xf32> to vector<32x128xf32>
    %c1_i32_18 = arith.constant 1 : i32
    %64 = tpu.dynamic_rotate %61 by %c1_i32_18 dim 0 : vector<32x128xf32>, i32 -> vector<32x128xf32>
    %cst_19 = arith.constant 0.000000e+00 : f32
    %65 = vector.broadcast %cst_19 : f32 to vector<32x128xf32>
    %66 = arith.select %55, %64, %65 : vector<32x128xi1>, vector<32x128xf32>
    %67 = arith.addf %62, %66 : vector<32x128xf32>
    %c31_i32 = arith.constant 31 : i32
    %68 = tpu.dynamic_rotate %63 by %c31_i32 dim 0 : vector<32x128xf32>, i32 -> vector<32x128xf32>
    %cst_20 = arith.constant 0.000000e+00 : f32
    %69 = vector.broadcast %cst_20 : f32 to vector<32x128xf32>
    %70 = arith.select %57, %68, %69 : vector<32x128xi1>, vector<32x128xf32>
    %71 = arith.addf %67, %70 : vector<32x128xf32>
    %cst_21 = arith.constant dense<0.000000e+00> : vector<128xf32>
    %72 = vector.multi_reduction <add>, %71, %cst_21 [0] : vector<32x128xf32> to vector<128xf32>
    %73 = vector.shape_cast %72 : vector<128xf32> to vector<1x128xf32>
    %74 = arith.mulf %71, %71 : vector<32x128xf32>
    %cst_22 = arith.constant dense<0.000000e+00> : vector<128xf32>
    %75 = vector.multi_reduction <add>, %74, %cst_22 [0] : vector<32x128xf32> to vector<128xf32>
    %76 = vector.shape_cast %75 : vector<128xf32> to vector<1x128xf32>
    %cst_23 = arith.constant dense<0.000000e+00> : vector<1x128xf32>
    %77 = tpu.matmul %73, %36, %cst_23 {dimension_numbers = #tpu.dot_dimension_numbers<[1], [0], [0], [1], [0, 0, 1, 1], [], []>} : vector<1x128xf32>, vector<128x128xf32>, vector<1x128xf32> -> vector<1x128xf32>
    %cst_24 = arith.constant 0.001953125 : f32
    %78 = vector.broadcast %cst_24 : f32 to vector<1x128xf32>
    %79 = arith.mulf %77, %78 : vector<1x128xf32>
    %cst_25 = arith.constant dense<0.000000e+00> : vector<1x128xf32>
    %80 = tpu.matmul %76, %36, %cst_25 {dimension_numbers = #tpu.dot_dimension_numbers<[1], [0], [0], [1], [0, 0, 1, 1], [], []>} : vector<1x128xf32>, vector<128x128xf32>, vector<1x128xf32> -> vector<1x128xf32>
    %cst_26 = arith.constant 0.001953125 : f32
    %81 = vector.broadcast %cst_26 : f32 to vector<1x128xf32>
    %82 = arith.mulf %80, %81 : vector<1x128xf32>
    %83 = arith.mulf %79, %79 : vector<1x128xf32>
    %84 = arith.subf %82, %83 : vector<1x128xf32>
    %cst_27 = arith.constant 9.99999974E-6 : f32
    %85 = vector.broadcast %cst_27 : f32 to vector<1x128xf32>
    %86 = arith.addf %84, %85 : vector<1x128xf32>
    %87 = math.rsqrt %86 : vector<1x128xf32>
    %c0_28 = arith.constant 0 : index
    %c0_29 = arith.constant 0 : index
    %88 = vector.load %arg3[%c0_28, %c0_29] : memref<1x128xf32, #tpu.memory_space<vmem>>, vector<1x128xf32>
    %89 = arith.mulf %87, %88 : vector<1x128xf32>
    %c0_30 = arith.constant 0 : index
    %c0_31 = arith.constant 0 : index
    %90 = vector.load %arg4[%c0_30, %c0_31] : memref<1x128xf32, #tpu.memory_space<vmem>>, vector<1x128xf32>
    %91 = arith.mulf %79, %89 : vector<1x128xf32>
    %92 = arith.subf %90, %91 : vector<1x128xf32>
    %93 = vector.broadcast %89 : vector<1x128xf32> to vector<32x128xf32>
    %94 = arith.mulf %71, %93 : vector<32x128xf32>
    %95 = vector.broadcast %92 : vector<1x128xf32> to vector<32x128xf32>
    %96 = arith.addf %94, %95 : vector<32x128xf32>
    %cst_32 = arith.constant 0.000000e+00 : f32
    %97 = vector.broadcast %cst_32 : f32 to vector<32x128xf32>
    %98 = arith.maximumf %96, %97 : vector<32x128xf32>
    %c0_33 = arith.constant 0 : index
    %c0_34 = arith.constant 0 : index
    %99 = vector.load %arg2[%c0_33, %c0_34] : memref<128x384xf32, #tpu.memory_space<vmem>>, vector<128x384xf32>
    %cst_35 = arith.constant dense<0.000000e+00> : vector<32x384xf32>
    %100 = tpu.matmul %98, %99, %cst_35 {dimension_numbers = #tpu.dot_dimension_numbers<[1], [0], [0], [1], [0, 0, 1, 1], [], []>} : vector<32x128xf32>, vector<128x384xf32>, vector<32x384xf32> -> vector<32x384xf32>
    %101 = vector.extract_strided_slice %100 {offsets = [0, 0], sizes = [32, 128], strides = [1, 1]} : vector<32x384xf32> to vector<32x128xf32>
    %102 = vector.extract_strided_slice %100 {offsets = [0, 128], sizes = [32, 128], strides = [1, 1]} : vector<32x384xf32> to vector<32x128xf32>
    %103 = vector.extract_strided_slice %100 {offsets = [0, 256], sizes = [32, 128], strides = [1, 1]} : vector<32x384xf32> to vector<32x128xf32>
    %c1_i32_36 = arith.constant 1 : i32
    %104 = tpu.dynamic_rotate %101 by %c1_i32_36 dim 0 : vector<32x128xf32>, i32 -> vector<32x128xf32>
    %cst_37 = arith.constant 0.000000e+00 : f32
    %105 = vector.broadcast %cst_37 : f32 to vector<32x128xf32>
    %106 = arith.select %55, %104, %105 : vector<32x128xi1>, vector<32x128xf32>
    %107 = arith.addf %102, %106 : vector<32x128xf32>
    %c31_i32_38 = arith.constant 31 : i32
    %108 = tpu.dynamic_rotate %103 by %c31_i32_38 dim 0 : vector<32x128xf32>, i32 -> vector<32x128xf32>
    %cst_39 = arith.constant 0.000000e+00 : f32
    %109 = vector.broadcast %cst_39 : f32 to vector<32x128xf32>
    %110 = arith.select %57, %108, %109 : vector<32x128xi1>, vector<32x128xf32>
    %111 = arith.addf %107, %110 : vector<32x128xf32>
    %cst_40 = arith.constant dense<0.000000e+00> : vector<128xf32>
    %112 = vector.multi_reduction <add>, %111, %cst_40 [0] : vector<32x128xf32> to vector<128xf32>
    %113 = vector.shape_cast %112 : vector<128xf32> to vector<1x128xf32>
    %114 = arith.mulf %111, %111 : vector<32x128xf32>
    %cst_41 = arith.constant dense<0.000000e+00> : vector<128xf32>
    %115 = vector.multi_reduction <add>, %114, %cst_41 [0] : vector<32x128xf32> to vector<128xf32>
    %116 = vector.shape_cast %115 : vector<128xf32> to vector<1x128xf32>
    %cst_42 = arith.constant dense<0.000000e+00> : vector<1x128xf32>
    %117 = tpu.matmul %113, %36, %cst_42 {dimension_numbers = #tpu.dot_dimension_numbers<[1], [0], [0], [1], [0, 0, 1, 1], [], []>} : vector<1x128xf32>, vector<128x128xf32>, vector<1x128xf32> -> vector<1x128xf32>
    %cst_43 = arith.constant 0.001953125 : f32
    %118 = vector.broadcast %cst_43 : f32 to vector<1x128xf32>
    %119 = arith.mulf %117, %118 : vector<1x128xf32>
    %cst_44 = arith.constant dense<0.000000e+00> : vector<1x128xf32>
    %120 = tpu.matmul %116, %36, %cst_44 {dimension_numbers = #tpu.dot_dimension_numbers<[1], [0], [0], [1], [0, 0, 1, 1], [], []>} : vector<1x128xf32>, vector<128x128xf32>, vector<1x128xf32> -> vector<1x128xf32>
    %cst_45 = arith.constant 0.001953125 : f32
    %121 = vector.broadcast %cst_45 : f32 to vector<1x128xf32>
    %122 = arith.mulf %120, %121 : vector<1x128xf32>
    %123 = arith.mulf %119, %119 : vector<1x128xf32>
    %124 = arith.subf %122, %123 : vector<1x128xf32>
    %cst_46 = arith.constant 9.99999974E-6 : f32
    %125 = vector.broadcast %cst_46 : f32 to vector<1x128xf32>
    %126 = arith.addf %124, %125 : vector<1x128xf32>
    %127 = math.rsqrt %126 : vector<1x128xf32>
    %c0_47 = arith.constant 0 : index
    %c0_48 = arith.constant 0 : index
    %128 = vector.load %arg5[%c0_47, %c0_48] : memref<1x128xf32, #tpu.memory_space<vmem>>, vector<1x128xf32>
    %129 = arith.mulf %127, %128 : vector<1x128xf32>
    %c0_49 = arith.constant 0 : index
    %c0_50 = arith.constant 0 : index
    %130 = vector.load %arg6[%c0_49, %c0_50] : memref<1x128xf32, #tpu.memory_space<vmem>>, vector<1x128xf32>
    %131 = arith.mulf %119, %129 : vector<1x128xf32>
    %132 = arith.subf %130, %131 : vector<1x128xf32>
    %133 = vector.broadcast %129 : vector<1x128xf32> to vector<32x128xf32>
    %134 = arith.mulf %111, %133 : vector<32x128xf32>
    %135 = vector.broadcast %132 : vector<1x128xf32> to vector<32x128xf32>
    %136 = arith.addf %134, %135 : vector<32x128xf32>
    %cst_51 = arith.constant 0.000000e+00 : f32
    %137 = vector.broadcast %cst_51 : f32 to vector<32x128xf32>
    %138 = arith.maximumf %136, %137 : vector<32x128xf32>
    %c0_52 = arith.constant 0 : index
    %c0_53 = arith.constant 0 : index
    %139 = vector.load %arg7[%c0_52, %c0_53] : memref<32x128xf32, #tpu.memory_space<vmem>>, vector<32x128xf32>
    tpu.vector_store %arg7[%c0_52, %c0_53], %138 {strides = array<i32>} : memref<32x128xf32, #tpu.memory_space<vmem>>, vector<32x128xf32>,
    return
  }
}

</mosaic_0001>

<bundles_post_ra>
// kernel: encoder_forward.1
= control target key start
LH: loop header
LB: loop body
LE: loop exit
PB: predicated region body
PF: predicated region fallthrough
CT: control target
= control target key end

     0   :  { %12 = vsyncpa [#allocation3], 0  ;;  %s1884_s24 = smov [#allocation2]   ;;  %s2453_s0 = inlined_call_operand.vmem [shape: f32[32,64], index: 0, kind: input, shape index: {}]   ;;  %s2454_s1 = inlined_call_operand.hbm [shape: f32[64,384], index: 1, kind: input, shape index: {}]   ;;  %s2455_s2 = inlined_call_operand.vmem [shape: f32[128,384], index: 2, kind: input, shape index: {}]   ;;  %s2456_s3 = inlined_call_operand.vmem [shape: f32[1,128], index: 3, kind: input, shape index: {}]   ;;  %s2457_s4 = inlined_call_operand.vmem [shape: f32[1,128], index: 4, kind: input, shape index: {}]   ;;  %s2458_s5 = inlined_call_operand.vmem [shape: f32[1,128], index: 5, kind: input, shape index: {}]   ;;  %s2459_s6 = inlined_call_operand.vmem [shape: f32[1,128], index: 6, kind: input, shape index: {}]   ;;  %s2460_s7 = inlined_call_operand.vmem [shape: f32[32,128], index: 7, kind: output, shape index: {}]  }
   0x1   :  { %s20_s25 = sshll.u32 %s1884_s24, 4  ;;  %s1860_s28 = scalar_lea.hbm %s2454_s1, 3072  ;;  %s21_s25 = int_to_ptr.vmem [resolvable:$true] %s20_s25 }
   0x2   :  { %p1861_p0 = scmp.ne.s32.totalorder %s2454_s1, %s1860_s28  ;;  %p1864_p1 = scmp.lt.u32.totalorder %s1860_s28, %s2454_s1 }
   0x4   :  { %p1866_p2 = pnand %p1864_p1, %p1861_p0 }
   0x6   :  { %1869 = shalt.err (!%p1866_p2)
}
   0x7   :  { %s1870_s10 = scalar_lea.vmem %s21_s25, 3072  ;;  %p1875_p4 = scmp.lt.s32.totalorder %s21_s25, %s21_s25 }
   0x8   :  { %p1871_p3 = scmp.ne.s32.totalorder %s21_s25, %s1870_s10  ;;  %p1876_p5 = scmp.lt.s32.totalorder %s1870_s10, %s1870_s10 }
   0xa   :  { %p1877_p6 = por %p1876_p5, %p1875_p4 }
   0xc   :  { %p1878_p7 = pnand %p1877_p6, %p1871_p3 }
   0xe   :  { %1881 = shalt.err (!%p1878_p7)
}
   0xf   :  { %s1885_s11 = smov 384   ;;  %s1886_s12 = smov 24  }
  0x10   :  { %26 = dma.hbm_to_vmem [thread:$0]  %s2454_s1, 3072, %s21_s25, [#allocation3], %s1885_s11, %s1885_s11, %s1886_s12  }
  0x11   :  { %1882 = dma.done.wait [#allocation3], 3072  }
  0x12   :  { %1883 = vsyncadd [#allocation3], 4294964224  ;;  %v1887_v0 = vmov 0.0   ;;  %v372_v1 = vld [vmem:[#allocation2 + $0x8] sm:$0xff]  ;;  %v375_v2 = vld [vmem:[#allocation2 + $0x20] sm:$0xff]  ;;  %vm395_vm0 = vcmask 523264   ;;  %v40_v41 = vlaneseq }
  0x13   :  { %472 = vmatprep.mubr.f32.mxu0 %v1887_v0  ;;  %v373_v3 = vld [vmem:[#allocation2 + $0x10] sm:$0xff]  ;;  %v1657_v4 = vpack.c.bf16 %v375_v2, %v372_v1  ;;  %v376_v5 = vld [vmem:[#allocation2 + $0x28] sm:$0xff]  ;;  %v371_v6 = vld [vmem:[#allocation2] sm:$0xff]  ;;  %v1888_v48 = vmov 0.0|0.0   ;;  %v1889_v52 = vmov 1.0|1.0  }
  0x14   :  { %v374_v7 = vld [vmem:[#allocation2 + $0x18] sm:$0xff]  ;;  %v1673_v8 = vpack.c.bf16 %v376_v5, %v373_v3  ;;  %v381_v11 = vld [vmem:[#allocation2 + $0x50] sm:$0xff]  ;;  %v379_v12 = vld [vmem:[#allocation2 + $0x40] sm:$0xff]  ;;  %v1967_v42 = vshrl.u32 %v40_v41, 7  ;;  %v250_v44 = vand.u32 127, %v40_v41 }
  0x15   :  { %v1659_v9 = vpack.c.bf16 %v374_v7, %v371_v6  ;;  %v378_v10 = vld [vmem:[#allocation2 + $0x38] sm:$0xff]  ;;  %1658 = vmatprep.subr.bf16.mxu0 %v1657_v4  ;;  %v377_v15 = vld [vmem:[#allocation2 + $0x30] sm:$0xff]  ;;  %v380_v16 = vld [vmem:[#allocation2 + $0x48] sm:$0xff] }
  0x16   :  { %v1661_v13 = vpack.c.bf16 %v381_v11, %v378_v10  ;;  %v382_v14 = vld [vmem:[#allocation2 + $0x58] sm:$0xff]  ;;  %1674 = vmatprep.subr.bf16.mxu1 %v1673_v8  ;;  %v1663_v18 = vpack.c.bf16 %v380_v16, %v377_v15  ;;  %v384_v19 = vld [vmem:[#allocation2 + $0x68] sm:$0xff]  ;;  %v387_v20 = vld [vmem:[#allocation2 + $0x80] sm:$0xff]  ;;  %v1970_v43 = vadd.s32 8, %v1967_v42  ;;  %v61_v45 = vand.u32 7, %v1967_v42 }
  0x17   :  { %1660 = vmatpush1.bf16.msra.mxu0 %v1659_v9  ;;  %v1677_v17 = vpack.c.bf16 %v382_v14, %v379_v12  ;;  %v385_v21 = vld [vmem:[#allocation2 + $0x70] sm:$0xff]  ;;  %1676 = vmatpush3.bf16.msra.mxu1 %v1673_v8  ;;  %v1665_v22 = vpack.c.bf16 %v387_v20, %v384_v19  ;;  %v388_v23 = vld [vmem:[#allocation2 + $0x88] sm:$0xff]  ;;  %v383_v24 = vld [vmem:[#allocation2 + $0x60] sm:$0xff]  ;;  %v1974_v47 = vand.u32 7, %v250_v44  ;;  %v1984_v50 = vadd.s32 16, %v1967_v42 }
  0x18   :  { %1662 = vmatprep.subr.bf16.mxu0 %v1661_v13  ;;  %v386_v25 = vld [vmem:[#allocation2 + $0x78] sm:$0xff]  ;;  %v1681_v26 = vpack.c.bf16 %v388_v23, %v385_v21  ;;  %v393_v28 = vld [vmem:[#allocation2 + $0xb0] sm:$0xff]  ;;  %v391_v29 = vld [vmem:[#allocation2 + $0xa0] sm:$0xff]  ;;  %v68_v46 = vand.u32 7, %v1970_v43  ;;  %v1988_v51 = vadd.s32 24, %v1967_v42  ;;  %v45_v55 = vadd.s32 32, %v1967_v42 }
  0x19   :  { %1678 = vmatprep.subr.bf16.mxu1 %v1677_v17  ;;  %v390_v27 = vld [vmem:[#allocation2 + $0x98] sm:$0xff]  ;;  %v1667_v31 = vpack.c.bf16 %v386_v25, %v383_v24  ;;  %v367_v32 = vld [vmem:[%s2453_s0] sm:$0xff]  ;;  %v389_v34 = vld [vmem:[#allocation2 + $0x90] sm:$0xff]  ;;  %vm263_vm1 = vcmp.eq.s32.totalorder %v61_v45, %v1974_v47  ;;  %v75_v53 = vand.u32 7, %v1984_v50  ;;  %v46_v56 = vadd.s32 40, %v1967_v42 }
  0x1a   :  { %v394_v30 = vld [vmem:[#allocation2 + $0xb8] sm:$0xff]  ;;  %v1669_v33 = vpack.c.bf16 %v393_v28, %v390_v27  ;;  %v392_v35 = vld [vmem:[#allocation2 + $0xa8] sm:$0xff]  ;;  %1473 = vmatprep.mubr.msk.f32.mxu1 %vm395_vm0, %v367_v32  ;;  %v369_v39 = vld [vmem:[%s2453_s0 + $0x10] sm:$0xff]  ;;  %vm264_vm2 = vcmp.eq.s32.totalorder %v68_v46, %v1974_v47  ;;  %v82_v54 = vand.u32 7, %v1988_v51  ;;  %v89_v58 = vand.u32 7, %v45_v55 }
  0x1b   :  { %1664 = vmatpush1.bf16.msra.mxu0 %v1663_v18  ;;  %1680 = vmatpush3.bf16.msra.mxu1 %v1677_v17  ;;  %v1685_v36 = vpack.c.bf16 %v394_v30, %v391_v29  ;;  %v1671_v37 = vpack.c.bf16 %v392_v35, %v389_v34  ;;  %v368_v38 = vld [vmem:[%s2453_s0 + $0x8] sm:$0xff]  ;;  %v370_v40 = vld [vmem:[%s2453_s0 + $0x18] sm:$0xff]  ;;  %vm1979_vm3 = vmpackc.low %vm264_vm2, %vm263_vm1  ;;  %vm265_vm4 = vcmp.eq.s32.totalorder %v75_v53, %v1974_v47  ;;  %v96_v59 = vand.u32 7, %v46_v56 }
  0x1c   :  { %1666 = vmatprep.subr.bf16.mxu0 %v1665_v22  ;;  %1682 = vmatprep.subr.bf16.mxu1 %v1681_v26  ;;  %vm266_vm5 = vcmp.eq.s32.totalorder %v82_v54, %v1974_v47  ;;  %vm267_vm7 = vcmp.eq.s32.totalorder %v89_v58, %v1974_v47  ;;  %v47_v60 = vadd.s32 48, %v1967_v42  ;;  %v48_v61 = vadd.s32 56, %v1967_v42 }
  0x1d   :  { %vm2004_vm6 = vmpackc.low %vm266_vm5, %vm265_vm4  ;;  %vm268_vm8 = vcmp.eq.s32.totalorder %v96_v59, %v1974_v47  ;;  %v49_v2 = vadd.s32 64, %v1967_v42  ;;  %v50_v3 = vadd.s32 72, %v1967_v42  ;;  %v51_v7 = vadd.s32 80, %v1967_v42 }
  0x1e   :  { %vm2020_vm9 = vmpackc.low %vm268_vm8, %vm267_vm7  ;;  %v103_v63 = vand.u32 7, %v47_v60  ;;  %v110_v1 = vand.u32 7, %v48_v61  ;;  %v52_v8 = vadd.s32 88, %v1967_v42  ;;  %v53_v12 = vadd.s32 96, %v1967_v42 }
  0x1f   :  { %1668 = vmatpush1.bf16.msra.mxu0 %v1667_v31  ;;  %1684 = vmatpush3.bf16.msra.mxu1 %v1681_v26  ;;  %v117_v5 = vand.u32 7, %v49_v2  ;;  %v124_v6 = vand.u32 7, %v50_v3  ;;  %v131_v10 = vand.u32 7, %v51_v7  ;;  %v54_v13 = vadd.s32 104, %v1967_v42 }
  0x20   :  { %1670 = vmatprep.subr.bf16.mxu0 %v1669_v33  ;;  %1686 = vmatprep.subr.bf16.mxu1 %v1685_v36  ;;  %vm269_vm10 = vcmp.eq.s32.totalorder %v103_v63, %v1974_v47  ;;  %vm270_vm11 = vcmp.eq.s32.totalorder %v110_v1, %v1974_v47  ;;  %v138_v11 = vand.u32 7, %v52_v8  ;;  %v145_v15 = vand.u32 7, %v53_v12 }
  0x21   :  { %vm2036_vm12 = vmpackc.low %vm270_vm11, %vm269_vm10  ;;  %vm271_vm13 = vcmp.eq.s32.totalorder %v117_v5, %v1974_v47  ;;  %vm272_vm14 = vcmp.eq.s32.totalorder %v124_v6, %v1974_v47  ;;  %v152_v16 = vand.u32 7, %v54_v13  ;;  %v55_v17 = vadd.s32 112, %v1967_v42 }
  0x22   :  { %vm2052_vm15 = vmpackc.low %vm272_vm14, %vm271_vm13  ;;  %vm274_vm1 = vcmp.eq.s32.totalorder %v138_v11, %v1974_v47  ;;  %vm275_vm4 = vcmp.eq.s32.totalorder %v145_v15, %v1974_v47  ;;  %v56_v18 = vadd.s32 120, %v1967_v42  ;;  %vm1890_vm13 = vmmov 0  }
  0x23   :  { %1672 = vmatpush1.bf16.msra.mxu0 %v1671_v37  ;;  %1688 = vmatpush3.bf16.msra.mxu1 %v1685_v36  ;;  %vm276_vm5 = vcmp.eq.s32.totalorder %v152_v16, %v1974_v47  ;;  %v159_v20 = vand.u32 7, %v55_v17  ;;  %v322_v29 = vand.u32 15, %v1970_v43  ;;  %vm603_vm14 = vcmp.lt.s32.totalorder %v1967_v42, 7 }
  0x24   :  { %1689 = vmatprep.subr.bf16.mxu0 %v1888_v48  ;;  %1713 = vmatprep.subr.bf16.mxu1 %v1888_v48  ;;  %vm2084_vm7 = vmpackc.low %vm276_vm5, %vm275_vm4  ;;  %v166_v21 = vand.u32 7, %v56_v18  ;;  %v329_v31 = vand.u32 15, %v1984_v50  ;;  %v315_v55 = vand.u32 15, %v1967_v42  ;;  %v336_v58 = vand.u32 15, %v1988_v51 }
  0x25   :  { %vm277_vm8 = vcmp.eq.s32.totalorder %v159_v20, %v1974_v47 }
  0x26   :  { %1285 = vmatmul.mubr.msk.f32.vlgmr.msra.gmra.mrb[0].mxu0 %vm395_vm0, %v367_v32  ;;  %1474 = vmatmul.mubr.msk.f32.vlgmr.msra.gmra.mrb[0].mxu1 %vm395_vm0, %v368_v38  ;;  %vm278_vm10 = vcmp.eq.s32.totalorder %v166_v21, %v1974_v47  ;;  %vm2124_vm4 = vcmp.ne.s32.totalorder %v329_v31, 0  ;;  %vm2144_vm5 = vcmp.ne.s32.totalorder %v315_v55, 0  ;;  %v816_v55 = vld [vmem:[%s2455_s2 + $0x28] sm:$0xff] }
  0x27   :  { %478 = vmatprep.mubr.f32.mxu0 %v1887_v0  ;;  %1476 = vmatprep.mubr.msk.f32.mxu1 %vm395_vm0, %v369_v39  ;;  %vm2098_vm11 = vmpackc.low %vm278_vm10, %vm277_vm8  ;;  %vm2148_vm8 = vcmp.ne.s32.totalorder %v336_v58, 15  ;;  %v818_v58 = vld [vmem:[%s2455_s2 + $0x38] sm:$0xff] }
  0x28   :  { %1691 = vmatpush3.bf16.msk.msra.mxu0 %vm1979_vm3, %v1889_v52  ;;  %1715 = vmatpush3.bf16.msk.msra.mxu1 %vm1979_vm3, %v1889_v52 }
  0x29   :  { %1692 = vmatprep.subr.bf16.mxu0 %v1888_v48  ;;  %1716 = vmatprep.subr.bf16.mxu1 %v1888_v48 }
  0x2a   :  { %1286 = vmatmul.mubr.msk.f32.gmra.mrb[2].mxu0 %vm395_vm0, %v368_v38  ;;  %1477 = vmatmul.mubr.msk.f32.gmra.mrb[2].mxu1 %vm395_vm0, %v370_v40 }
  0x2b   :  { %484 = vmatprep.mubr.f32.mxu0 %v1887_v0  ;;  %1546 = vmatprep.mubr.msk.f32.mxu1 %vm1890_vm13, %v1887_v0 }
  0x2c   :  { %1694 = vmatpush3.bf16.msk.msra.mxu0 %vm2004_vm6, %v1889_v52  ;;  %1718 = vmatpush3.bf16.msk.msra.mxu1 %vm2004_vm6, %v1889_v52 }
  0x2d   :  { %1695 = vmatprep.subr.bf16.mxu0 %v1888_v48  ;;  %1719 = vmatprep.subr.bf16.mxu1 %v1888_v48 }
  0x2e   :  { %1287 = vmatmul.mubr.msk.f32.gmra.mrb[4].mxu0 %vm395_vm0, %v369_v39 }
  0x2f   :  { %490 = vmatprep.mubr.f32.mxu0 %v1887_v0 }
  0x30   :  { %1697 = vmatpush3.bf16.msk.msra.mxu0 %vm2020_vm9, %v1889_v52  ;;  %1721 = vmatpush3.bf16.msk.msra.mxu1 %vm2020_vm9, %v1889_v52 }
  0x31   :  { %1698 = vmatprep.subr.bf16.mxu0 %v1888_v48  ;;  %1722 = vmatprep.subr.bf16.mxu1 %v1888_v48 }
  0x32   :  { %1288 = vmatmul.mubr.msk.f32.gmra.mrb[6].mxu0 %vm395_vm0, %v370_v40  ;;  %vm273_vm0 = vcmp.eq.s32.totalorder %v131_v10, %v1974_v47 }
  0x33   :  { %vm2068_vm2 = vmpackc.low %vm274_vm1, %vm273_vm0  ;;  %1511 = vmatprep.mubr.msk.f32.mxu0 %vm1890_vm13, %v1887_v0  ;;  %vm586_vm0 = vcmp.lt.s32.totalorder %v1967_v42, 1  ;;  %vm2120_vm1 = vcmp.ne.s32.totalorder %v322_v29, 15 }
  0x34   :  { %1700 = vmatpush3.bf16.msk.msra.mxu0 %vm2036_vm12, %v1889_v52  ;;  %1724 = vmatpush3.bf16.msk.msra.mxu1 %vm2036_vm12, %v1889_v52 }
  0x35   :  { %1701 = vmatprep.subr.bf16.mxu0 %v1888_v48  ;;  %1725 = vmatprep.subr.bf16.mxu1 %v1888_v48 }
  0x38   :  { %1703 = vmatpush3.bf16.msk.msra.mxu0 %vm2052_vm15, %v1889_v52  ;;  %1727 = vmatpush3.bf16.msk.msra.mxu1 %vm2052_vm15, %v1889_v52 }
  0x39   :  { %1704 = vmatprep.subr.bf16.mxu0 %v1888_v48  ;;  %1728 = vmatprep.subr.bf16.mxu1 %v1888_v48 }
  0x3c   :  { %1706 = vmatpush3.bf16.msk.msra.mxu0 %vm2068_vm2, %v1889_v52  ;;  %1730 = vmatpush3.bf16.msk.msra.mxu1 %vm2068_vm2, %v1889_v52 }
  0x3d   :  { %1707 = vmatprep.subr.bf16.mxu0 %v1888_v48  ;;  %1731 = vmatprep.subr.bf16.mxu1 %v1888_v48 }
  0x40   :  { %1709 = vmatpush3.bf16.msk.msra.mxu0 %vm2084_vm7, %v1889_v52  ;;  %1733 = vmatpush3.bf16.msk.msra.mxu1 %vm2084_vm7, %v1889_v52 }
  0x41   :  { %1710 = vmatprep.subr.bf16.mxu0 %v1888_v48  ;;  %1734 = vmatprep.subr.bf16.mxu1 %v1888_v48 }
  0x44   :  { %1712 = vmatpush3.bf16.msk.msra.mxu0 %vm2098_vm11, %v1889_v52  ;;  %1736 = vmatpush3.bf16.msk.msra.mxu1 %vm2098_vm11, %v1889_v52 }
  0xf9   :  { %v474_v23 = vpop.f32.mrb[0].mxu0  ;;  %v1475_v25 = vpop.f32.mrb[0].mxu1 }
  0xfa   :  { %v476_v24 = vpop.f32.mrb[1].mxu0  ;;  %v563_v26 = vpop.f32.mrb[1].mxu1  ;;  %v600_v27 = vrot.slane %v1475_v25, 1  ;;  %v582_v32 = vrot.slane %v474_v23, 7 }
  0xfb   :  { %v599_v28 = vrot.slane %v563_v26, 1 }
  0xfd   :  { %v480_v30 = vpop.f32.mrb[2].mxu0  ;;  %v606_v33 = vsel %vm603_vm14, %v599_v28, %v600_v27  ;;  %v1478_v35 = vpop.f32.mrb[2].mxu1 }
  0xfe   :  { %v583_v34 = vrot.slane %v480_v30, 7  ;;  %v482_v36 = vpop.f32.mrb[3].mxu0  ;;  %v602_v37 = vrot.slane %v1478_v35, 1  ;;  %v573_v38 = vpop.f32.mrb[3].mxu1 }
  0xff   :  { %v601_v41 = vrot.slane %v573_v38, 1 }
 0x100   :  { %v589_v39 = vsel %vm586_vm0, %v582_v32, %v583_v34  ;;  %v607_v46 = vsel %vm603_vm14, %v602_v37, %v599_v28 }
 0x101   :  { %v596_v43 = vadd.f32 %v589_v39, %v482_v36  ;;  %v486_v44 = vpop.f32.mrb[4].mxu0  ;;  %v605_v47 = vsel %vm603_vm14, %v600_v27, %v601_v41  ;;  %v604_v54 = vsel %vm603_vm14, %v601_v41, %v602_v37  ;;  %v611_v13 = vsel %vm2148_vm8, %v607_v46, 0.0 }
 0x102   :  { %v584_v50 = vrot.slane %v486_v44, 7  ;;  %v488_v53 = vpop.f32.mrb[5].mxu0  ;;  %v609_v56 = vsel %vm2120_vm1, %v605_v47, 0.0  ;;  %v815_v44 = vld [vmem:[%s2455_s2 + $0x20] sm:$0xff] }
 0x103   :  { %v2138_v59 = vadd.f32 %v609_v56, %v596_v43  ;;  %v812_v43 = vld [vmem:[%s2455_s2 + $0x8] sm:$0xff]  ;;  %v811_v47 = vld [vmem:[%s2455_s2] sm:$0xff] }
 0x104   :  { %v588_v60 = vsel %vm586_vm0, %v583_v34, %v584_v50  ;;  %v1737_v46 = vpack.c.bf16 %v815_v44, %v812_v43  ;;  %v842_v44 = vld [vmem:[%s2455_s2 + $0xf8] sm:$0xff] }
 0x105   :  { %v593_v61 = vsel %vm2124_vm4, %v588_v60, 0.0  ;;  %v492_v63 = vpop.f32.mrb[6].mxu0  ;;  %v626_v17 = vmul.f32 %v2138_v59, %v2138_v59  ;;  %v821_v60 = vld [vmem:[%s2455_s2 + $0x50] sm:$0xff] }
 0x106   :  { %v597_v1 = vadd.f32 %v593_v61, %v488_v53  ;;  %v585_v3 = vrot.slane %v492_v63, 7  ;;  %v494_v5 = vpop.f32.mrb[7].mxu0  ;;  %v813_v53 = vld [vmem:[%s2455_s2 + $0x10] sm:$0xff]  ;;  %1738 = vmatprep.subr.bf16.mxu0 %v1737_v46  ;;  %v1741_v61 = vpack.c.bf16 %v821_v60, %v818_v58  ;;  %v848_v60 = vld [vmem:[%s2455_s2 + $0x128] sm:$0xff] }
 0x107   :  { %v1769_v56 = vpack.c.bf16 %v816_v55, %v813_v53  ;;  %v817_v63 = vld [vmem:[%s2455_s2 + $0x30] sm:$0xff]  ;;  %v844_v53 = vld [vmem:[%s2455_s2 + $0x108] sm:$0xff] }
 0x108   :  { %v2152_v51 = vadd.f32 %v604_v54, %v597_v1  ;;  %v590_v7 = vsel %vm586_vm0, %v585_v3, %v582_v32  ;;  %v587_v8 = vsel %vm586_vm0, %v584_v50, %v585_v3  ;;  %v814_v50 = vld [vmem:[%s2455_s2 + $0x18] sm:$0xff]  ;;  %v820_v1 = vld [vmem:[%s2455_s2 + $0x48] sm:$0xff]  ;;  %v819_v3 = vld [vmem:[%s2455_s2 + $0x40] sm:$0xff] }
 0x109   :  { %v591_v10 = vsel %vm2144_vm5, %v590_v7, 0.0  ;;  %v598_v11 = vadd.f32 %v587_v8, %v494_v5  ;;  %v1739_v54 = vpack.c.bf16 %v814_v50, %v811_v47  ;;  %1770 = vmatprep.subr.bf16.mxu1 %v1769_v56  ;;  %v1743_v5 = vpack.c.bf16 %v820_v1, %v817_v63  ;;  %v822_v7 = vld [vmem:[%s2455_s2 + $0x58] sm:$0xff]  ;;  %v845_v46 = vld [vmem:[%s2455_s2 + $0x110] sm:$0xff]  ;;  %v847_v63 = vld [vmem:[%s2455_s2 + $0x120] sm:$0xff] }
 0x10a   :  { %v595_v12 = vadd.f32 %v591_v10, %v476_v24  ;;  %v627_v21 = vmul.f32 %v2152_v51, %v2152_v51  ;;  %v1773_v8 = vpack.c.bf16 %v822_v7, %v819_v3  ;;  %v824_v10 = vld [vmem:[%s2455_s2 + $0x68] sm:$0xff]  ;;  %v1757_v47 = vpack.c.bf16 %v845_v46, %v842_v44  ;;  %v841_v50 = vld [vmem:[%s2455_s2 + $0xf0] sm:$0xff]  ;;  %v850_v3 = vld [vmem:[%s2455_s2 + $0x138] sm:$0xff] }
 0x10b   :  { %v2162_v15 = vadd.f32 %v611_v13, %v598_v11  ;;  %v827_v11 = vld [vmem:[%s2455_s2 + $0x80] sm:$0xff]  ;;  %v1759_v55 = vpack.c.bf16 %v844_v53, %v841_v50  ;;  %v852_v7 = vld [vmem:[%s2455_s2 + $0x148] sm:$0xff] }
 0x10c   :  { %v2164_v16 = vadd.f32 %v606_v33, %v595_v12  ;;  %v1745_v12 = vpack.c.bf16 %v827_v11, %v824_v10  ;;  %v823_v13 = vld [vmem:[%s2455_s2 + $0x60] sm:$0xff]  ;;  %v854_v11 = vld [vmem:[%s2455_s2 + $0x158] sm:$0xff] }
 0x10d   :  { %v628_v26 = vmul.f32 %v2162_v15, %v2162_v15 }
 0x10e   :  { %v625_v18 = vmul.f32 %v2164_v16, %v2164_v16  ;;  %v616_v20 = vadd.f32 %v2138_v59, %v2164_v16 }
 0x110   :  { %v617_v23 = vadd.f32 %v616_v20, %v2152_v51  ;;  %v629_v24 = vadd.f32 %v626_v17, %v625_v18  ;;  %v826_v17 = vld [vmem:[%s2455_s2 + $0x78] sm:$0xff]  ;;  %v825_v18 = vld [vmem:[%s2455_s2 + $0x70] sm:$0xff] }
 0x111   :  { %v1747_v20 = vpack.c.bf16 %v826_v17, %v823_v13  ;;  %v853_v13 = vld [vmem:[%s2455_s2 + $0x150] sm:$0xff] }
 0x112   :  { %v618_v25 = vadd.f32 %v617_v23, %v2162_v15  ;;  %v630_v27 = vadd.f32 %v629_v24, %v627_v21  ;;  %v828_v21 = vld [vmem:[%s2455_s2 + $0x88] sm:$0xff]  ;;  %v830_v24 = vld [vmem:[%s2455_s2 + $0x98] sm:$0xff] }
 0x113   :  { %v1777_v23 = vpack.c.bf16 %v828_v21, %v825_v18  ;;  %v856_v18 = vld [vmem:[%s2455_s2 + $0x168] sm:$0xff]  ;;  %v858_v21 = vld [vmem:[%s2455_s2 + $0x178] sm:$0xff] }
 0x114   :  { %v619_v28 = vrot.slane %v618_v25, 4  ;;  %v631_v29 = vadd.f32 %v630_v27, %v628_v26  ;;  %v829_v27 = vld [vmem:[%s2455_s2 + $0x90] sm:$0xff] }
 0x116   :  { %v620_v30 = vadd.f32 %v619_v28, %v618_v25  ;;  %v632_v31 = vrot.slane %v631_v29, 4  ;;  %v833_v25 = vld [vmem:[%s2455_s2 + $0xb0] sm:$0xff]  ;;  %v832_v28 = vld [vmem:[%s2455_s2 + $0xa8] sm:$0xff] }
 0x117   :  { %v1749_v26 = vpack.c.bf16 %v833_v25, %v830_v24 }
 0x118   :  { %v621_v32 = vrot.slane %v620_v30, 2  ;;  %v633_v33 = vadd.f32 %v632_v31, %v631_v29  ;;  %v831_v29 = vld [vmem:[%s2455_s2 + $0xa0] sm:$0xff]  ;;  %v834_v31 = vld [vmem:[%s2455_s2 + $0xb8] sm:$0xff] }
 0x11a   :  { %v622_v34 = vadd.f32 %v621_v32, %v620_v30  ;;  %v634_v35 = vrot.slane %v633_v33, 2  ;;  %v1751_v30 = vpack.c.bf16 %v832_v28, %v829_v27  ;;  %v1781_v32 = vpack.c.bf16 %v834_v31, %v831_v29 }
 0x11c   :  { %v623_v36 = vrot.slane %v622_v34, 1  ;;  %v635_v37 = vadd.f32 %v634_v35, %v633_v33  ;;  %v836_v33 = vld [vmem:[%s2455_s2 + $0xc8] sm:$0xff] }
 0x11e   :  { %v624_v38 = vadd.f32 %v623_v36, %v622_v34  ;;  %v636_v39 = vrot.slane %v635_v37, 1  ;;  %v839_v34 = vld [vmem:[%s2455_s2 + $0xe0] sm:$0xff] }
 0x11f   :  { %v1753_v35 = vpack.c.bf16 %v839_v34, %v836_v33  ;;  %v835_v36 = vld [vmem:[%s2455_s2 + $0xc0] sm:$0xff] }
 0x120   :  { %1512 = vmatmul.mubr.f32.vlgmr.msra.gmra.mrb[8].mxu0 %v624_v38  ;;  %v637_v41 = vadd.f32 %v636_v39, %v635_v37  ;;  %v838_v37 = vld [vmem:[%s2455_s2 + $0xd8] sm:$0xff]  ;;  %v837_v38 = vld [vmem:[%s2455_s2 + $0xd0] sm:$0xff]  ;;  %v784_v34 = vld [vmem:[%s2456_s3] sm:$0x1] }
 0x121   :  { %923 = vmatprep.mubr.f32.mxu0 %v1887_v0  ;;  %1740 = vmatpush1.bf16.msra.mxu0 %v1739_v54  ;;  %v1755_v39 = vpack.c.bf16 %v838_v37, %v835_v36  ;;  %v843_v54 = vld [vmem:[%s2455_s2 + $0x100] sm:$0xff] }
 0x122   :  { %1547 = vmatmul.mubr.f32.vlgmr.msra.gmra.mrb[4].mxu1 %v637_v41  ;;  %1742 = vmatprep.subr.bf16.mxu0 %v1741_v61  ;;  %v840_v41 = vld [vmem:[%s2455_s2 + $0xe8] sm:$0xff]  ;;  %v851_v61 = vld [vmem:[%s2455_s2 + $0x140] sm:$0xff] }
 0x123   :  { %1772 = vmatpush3.bf16.msra.mxu1 %v1769_v56  ;;  %v1785_v43 = vpack.c.bf16 %v840_v41, %v837_v38  ;;  %v846_v56 = vld [vmem:[%s2455_s2 + $0x118] sm:$0xff]  ;;  %v1761_v1 = vpack.c.bf16 %v851_v61, %v848_v60  ;;  %v786_v38 = vld [vmem:[%s2457_s4] sm:$0x1] }
 0x124   :  { %1774 = vmatprep.subr.bf16.mxu1 %v1773_v8  ;;  %v1789_v58 = vpack.c.bf16 %v846_v56, %v843_v54 }
 0x125   :  { %1744 = vmatpush1.bf16.msra.mxu0 %v1743_v5  ;;  %v849_v5 = vld [vmem:[%s2455_s2 + $0x130] sm:$0xff] }
 0x126   :  { %1746 = vmatprep.subr.bf16.mxu0 %v1745_v12  ;;  %v1793_v10 = vpack.c.bf16 %v852_v7, %v849_v5  ;;  %v857_v12 = vld [vmem:[%s2455_s2 + $0x170] sm:$0xff] }
 0x127   :  { %1776 = vmatpush3.bf16.msra.mxu1 %v1773_v8  ;;  %v1763_v8 = vpack.c.bf16 %v850_v3, %v847_v63  ;;  %v1765_v17 = vpack.c.bf16 %v857_v12, %v854_v11 }
 0x128   :  { %1778 = vmatprep.subr.bf16.mxu1 %v1777_v23 }
 0x129   :  { %1748 = vmatpush1.bf16.msra.mxu0 %v1747_v20  ;;  %v855_v20 = vld [vmem:[%s2455_s2 + $0x160] sm:$0xff] }
 0x12a   :  { %1750 = vmatprep.subr.bf16.mxu0 %v1749_v26  ;;  %v1797_v24 = vpack.c.bf16 %v858_v21, %v855_v20 }
 0x12b   :  { %1780 = vmatpush3.bf16.msra.mxu1 %v1777_v23  ;;  %v1767_v23 = vpack.c.bf16 %v856_v18, %v853_v13 }
 0x12c   :  { %1782 = vmatprep.subr.bf16.mxu1 %v1781_v32 }
 0x12d   :  { %1752 = vmatpush1.bf16.msra.mxu0 %v1751_v30 }
 0x12e   :  { %1754 = vmatprep.subr.bf16.mxu0 %v1753_v35  ;;  %v2329_v35 = vsub.s32 0, %v1967_v42 }
 0x12f   :  { %1784 = vmatpush3.bf16.msra.mxu1 %v1781_v32 }
 0x130   :  { %1786 = vmatprep.subr.bf16.mxu1 %v1785_v43 }
 0x131   :  { %1756 = vmatpush1.bf16.msra.mxu0 %v1755_v39 }
 0x132   :  { %1758 = vmatprep.subr.bf16.mxu0 %v1757_v47 }
 0x133   :  { %1788 = vmatpush3.bf16.msra.mxu1 %v1785_v43 }
 0x134   :  { %1790 = vmatprep.subr.bf16.mxu1 %v1789_v58 }
 0x135   :  { %1760 = vmatpush1.bf16.msra.mxu0 %v1759_v55 }
 0x136   :  { %1762 = vmatprep.subr.bf16.mxu0 %v1761_v1 }
 0x137   :  { %1792 = vmatpush3.bf16.msra.mxu1 %v1789_v58 }
 0x138   :  { %1794 = vmatprep.subr.bf16.mxu1 %v1793_v10 }
 0x139   :  { %1764 = vmatpush1.bf16.msra.mxu0 %v1763_v8 }
 0x13a   :  { %1766 = vmatprep.subr.bf16.mxu0 %v1765_v17 }
 0x13b   :  { %1796 = vmatpush3.bf16.msra.mxu1 %v1793_v10 }
 0x13c   :  { %1798 = vmatprep.subr.bf16.mxu1 %v1797_v24 }
 0x13d   :  { %1768 = vmatpush1.bf16.msra.mxu0 %v1767_v23 }
 0x13e   :  { %1801 = vmatprep.subr.bf16.mxu0 %v1888_v48 }
 0x13f   :  { %1800 = vmatpush3.bf16.msra.mxu1 %v1797_v24 }
 0x140   :  { %1825 = vmatprep.subr.bf16.mxu1 %v1888_v48 }
 0x1f3   :  { %v704_v25 = vpop.f32.mrb[8].mxu0 }
 0x1f4   :  { %v708_v26 = vmul.f32 0.001953125, %v704_v25  ;;  %v1513_v27 = vpop.f32.mrb[9].mxu0 }
 0x1f5   :  { %v775_v28 = vpop.f32.mrb[4].mxu1 }
 0x1f6   :  { %v780_v29 = vmul.f32 %v708_v26, %v708_v26  ;;  %v779_v30 = vmul.f32 0.001953125, %v775_v28  ;;  %v1548_v31 = vpop.f32.mrb[5].mxu1 }
 0x1f8   :  { %v781_v32 = vsub.f32 %v779_v30, %v780_v29 }
 0x1fa   :  { %v782_v33 = vadd.f32 1e-05, %v781_v32 }
 0x1fc   :  { %1856 = vrsqrt.f32 %v782_v33 }
 0x206   :  { %v1857_v36 = vpop.eup %1856 }
 0x207   :  { %v785_v37 = vmul.f32 %v1857_v36, %v784_v34 }
 0x209   :  { %v787_v39 = vmul.f32 %v785_v37, %v708_v26  ;;  %v792_v41 = vrot.slane %v785_v37, %v2329_v35 }
 0x20b   :  { %v788_v43 = vsub.f32 %v786_v38, %v787_v39  ;;  %v793_v44 = vmul.f32 %v792_v41, %v2164_v16  ;;  %v794_v47 = vmul.f32 %v792_v41, %v2138_v59  ;;  %v795_v50 = vmul.f32 %v792_v41, %v2152_v51 }
 0x20c   :  { %v796_v53 = vmul.f32 %v792_v41, %v2162_v15 }
 0x20d   :  { %v801_v46 = vrot.slane %v788_v43, %v2329_v35 }
 0x20f   :  { %v803_v54 = vadd.f32 %v801_v46, %v793_v44  ;;  %v804_v55 = vadd.f32 %v801_v46, %v794_v47  ;;  %v805_v56 = vadd.f32 %v801_v46, %v795_v50  ;;  %v806_v58 = vadd.f32 %v801_v46, %v796_v53 }
 0x211   :  { %v807_v60 = vmax.f32 %v803_v54, 0.0  ;;  %v808_v61 = vmax.f32 %v804_v55, 0.0  ;;  %v809_v63 = vmax.f32 %v805_v56, 0.0  ;;  %v810_v59 = vmax.f32 %v806_v58, 0.0 }
 0x213   :  { %924 = vmatmul.mubr.f32.vlgmr.msra.gmra.mrb[10].mxu0 %v807_v60  ;;  %1581 = vmatprep.mubr.f32.mxu1 %v807_v60 }
 0x214   :  { %1582 = vmatmul.mubr.f32.vlgmr.msra.gmra.mrb[6].mxu1 %v808_v61  ;;  %929 = vmatprep.mubr.f32.mxu0 %v1887_v0 }
 0x215   :  { %1584 = vmatprep.mubr.f32.mxu1 %v809_v63  ;;  %1803 = vmatpush3.bf16.msk.msra.mxu0 %vm1979_vm3, %v1889_v52 }
 0x216   :  { %1827 = vmatpush3.bf16.msk.msra.mxu1 %vm1979_vm3, %v1889_v52  ;;  %1804 = vmatprep.subr.bf16.mxu0 %v1888_v48 }
 0x217   :  { %930 = vmatmul.mubr.f32.gmra.mrb[12].mxu0 %v808_v61  ;;  %1828 = vmatprep.subr.bf16.mxu1 %v1888_v48 }
 0x218   :  { %1585 = vmatmul.mubr.f32.gmra.mrb[8].mxu1 %v810_v59  ;;  %935 = vmatprep.mubr.f32.mxu0 %v1887_v0 }
 0x219   :  { %1806 = vmatpush3.bf16.msk.msra.mxu0 %vm2004_vm6, %v1889_v52  ;;  %1654 = vmatprep.mubr.msk.f32.mxu1 %vm1890_vm13, %v1887_v0 }
 0x21a   :  { %1830 = vmatpush3.bf16.msk.msra.mxu1 %vm2004_vm6, %v1889_v52  ;;  %1807 = vmatprep.subr.bf16.mxu0 %v1888_v48 }
 0x21b   :  { %936 = vmatmul.mubr.f32.gmra.mrb[14].mxu0 %v809_v63  ;;  %1831 = vmatprep.subr.bf16.mxu1 %v1888_v48 }
 0x21c   :  { %941 = vmatprep.mubr.f32.mxu0 %v1887_v0 }
 0x21d   :  { %1809 = vmatpush3.bf16.msk.msra.mxu0 %vm2020_vm9, %v1889_v52 }
 0x21e   :  { %1833 = vmatpush3.bf16.msk.msra.mxu1 %vm2020_vm9, %v1889_v52  ;;  %1810 = vmatprep.subr.bf16.mxu0 %v1888_v48 }
 0x21f   :  { %942 = vmatmul.mubr.f32.gmra.mrb[16].mxu0 %v810_v59  ;;  %1834 = vmatprep.subr.bf16.mxu1 %v1888_v48 }
 0x220   :  { %1619 = vmatprep.mubr.msk.f32.mxu0 %vm1890_vm13, %v1887_v0 }
 0x221   :  { %1812 = vmatpush3.bf16.msk.msra.mxu0 %vm2036_vm12, %v1889_v52 }
 0x222   :  { %1836 = vmatpush3.bf16.msk.msra.mxu1 %vm2036_vm12, %v1889_v52  ;;  %1813 = vmatprep.subr.bf16.mxu0 %v1888_v48 }
 0x223   :  { %1837 = vmatprep.subr.bf16.mxu1 %v1888_v48 }
 0x225   :  { %1815 = vmatpush3.bf16.msk.msra.mxu0 %vm2052_vm15, %v1889_v52 }
 0x226   :  { %1839 = vmatpush3.bf16.msk.msra.mxu1 %vm2052_vm15, %v1889_v52  ;;  %1816 = vmatprep.subr.bf16.mxu0 %v1888_v48 }
 0x227   :  { %1840 = vmatprep.subr.bf16.mxu1 %v1888_v48 }
 0x229   :  { %1818 = vmatpush3.bf16.msk.msra.mxu0 %vm2068_vm2, %v1889_v52 }
 0x22a   :  { %1842 = vmatpush3.bf16.msk.msra.mxu1 %vm2068_vm2, %v1889_v52  ;;  %1819 = vmatprep.subr.bf16.mxu0 %v1888_v48 }
 0x22b   :  { %1843 = vmatprep.subr.bf16.mxu1 %v1888_v48 }
 0x22d   :  { %1821 = vmatpush3.bf16.msk.msra.mxu0 %vm2084_vm7, %v1889_v52 }
 0x22e   :  { %1845 = vmatpush3.bf16.msk.msra.mxu1 %vm2084_vm7, %v1889_v52  ;;  %1822 = vmatprep.subr.bf16.mxu0 %v1888_v48 }
 0x22f   :  { %1846 = vmatprep.subr.bf16.mxu1 %v1888_v48 }
 0x231   :  { %1824 = vmatpush3.bf16.msk.msra.mxu0 %vm2098_vm11, %v1889_v52 }
 0x232   :  { %1848 = vmatpush3.bf16.msk.msra.mxu1 %vm2098_vm11, %v1889_v52 }
 0x2e6   :  { %v925_v0 = vpop.f32.mrb[10].mxu0 }
 0x2e7   :  { %v927_v49 = vpop.f32.mrb[11].mxu0  ;;  %v1583_v57 = vpop.f32.mrb[6].mxu1  ;;  %v1033_v19 = vrot.slane %v925_v0, 7 }
 0x2e8   :  { %v1050_v62 = vrot.slane %v1583_v57, 1  ;;  %v1014_v4 = vpop.f32.mrb[7].mxu1 }
 0x2e9   :  { %v1049_v9 = vrot.slane %v1014_v4, 1 }
 0x2ea   :  { %v931_v14 = vpop.f32.mrb[12].mxu0 }
 0x2eb   :  { %v1055_v51 = vsel %vm603_vm14, %v1049_v9, %v1050_v62  ;;  %v1034_v48 = vrot.slane %v931_v14, 7  ;;  %v933_v15 = vpop.f32.mrb[13].mxu0  ;;  %v1586_v16 = vpop.f32.mrb[8].mxu1 }
 0x2ec   :  { %v1052_v1 = vrot.slane %v1586_v16, 1  ;;  %v1024_v3 = vpop.f32.mrb[9].mxu1  ;;  %v1235_v16 = vld [vmem:[%s2459_s6] sm:$0x1] }
 0x2ed   :  { %v1039_v22 = vsel %vm586_vm0, %v1033_v19, %v1034_v48  ;;  %v1051_v52 = vrot.slane %v1024_v3, 1 }
 0x2ee   :  { %v1046_v5 = vadd.f32 %v1039_v22, %v933_v15  ;;  %v937_v7 = vpop.f32.mrb[14].mxu0  ;;  %v1056_v8 = vsel %vm603_vm14, %v1052_v1, %v1049_v9 }
 0x2ef   :  { %v1054_v10 = vsel %vm603_vm14, %v1050_v62, %v1051_v52  ;;  %v1035_v11 = vrot.slane %v937_v7, 7  ;;  %v939_v12 = vpop.f32.mrb[15].mxu0  ;;  %v1053_v13 = vsel %vm603_vm14, %v1051_v52, %v1052_v1  ;;  %v1060_v45 = vsel %vm2148_vm8, %v1056_v8, 0.0 }
 0x2f0   :  { %v1058_v17 = vsel %vm2120_vm1, %v1054_v10, 0.0 }
 0x2f1   :  { %v1062_v18 = vadd.f32 %v1058_v17, %v1046_v5  ;;  %v1038_v20 = vsel %vm586_vm0, %v1034_v48, %v1035_v11 }
 0x2f2   :  { %v1043_v21 = vsel %vm2124_vm4, %v1038_v20, 0.0  ;;  %v943_v23 = vpop.f32.mrb[16].mxu0 }
 0x2f3   :  { %v1047_v24 = vadd.f32 %v1043_v21, %v939_v12  ;;  %v1036_v25 = vrot.slane %v943_v23, 7  ;;  %v945_v26 = vpop.f32.mrb[17].mxu0  ;;  %v1075_v34 = vmul.f32 %v1062_v18, %v1062_v18 }
 0x2f5   :  { %v1063_v27 = vadd.f32 %v1053_v13, %v1047_v24  ;;  %v1040_v28 = vsel %vm586_vm0, %v1036_v25, %v1033_v19  ;;  %v1037_v29 = vsel %vm586_vm0, %v1035_v11, %v1036_v25 }
 0x2f6   :  { %v1041_v40 = vsel %vm2144_vm5, %v1040_v28, 0.0  ;;  %v1048_v30 = vadd.f32 %v1037_v29, %v945_v26 }
 0x2f7   :  { %v1045_v31 = vadd.f32 %v1041_v40, %v927_v49  ;;  %v1076_v38 = vmul.f32 %v1063_v27, %v1063_v27 }
 0x2f8   :  { %v1064_v32 = vadd.f32 %v1060_v45, %v1048_v30 }
 0x2f9   :  { %v1061_v33 = vadd.f32 %v1055_v51, %v1045_v31  ;;  %v1233_v51 = vld [vmem:[%s2458_s5] sm:$0x1] }
 0x2fa   :  { %v1077_v44 = vmul.f32 %v1064_v32, %v1064_v32 }
 0x2fb   :  { %v1074_v36 = vmul.f32 %v1061_v33, %v1061_v33  ;;  %v1065_v37 = vadd.f32 %v1062_v18, %v1061_v33 }
 0x2fd   :  { %v1066_v39 = vadd.f32 %v1065_v37, %v1063_v27  ;;  %v1078_v41 = vadd.f32 %v1075_v34, %v1074_v36 }
 0x2ff   :  { %v1067_v43 = vadd.f32 %v1066_v39, %v1064_v32  ;;  %v1079_v42 = vadd.f32 %v1078_v41, %v1076_v38 }
 0x301   :  { %v1068_v46 = vrot.slane %v1067_v43, 4  ;;  %v1080_v47 = vadd.f32 %v1079_v42, %v1077_v44 }
 0x303   :  { %v1069_v2 = vadd.f32 %v1068_v46, %v1067_v43  ;;  %v1081_v50 = vrot.slane %v1080_v47, 4 }
 0x305   :  { %v1070_v53 = vrot.slane %v1069_v2, 2  ;;  %v1082_v54 = vadd.f32 %v1081_v50, %v1080_v47 }
 0x307   :  { %v1071_v55 = vadd.f32 %v1070_v53, %v1069_v2  ;;  %v1083_v6 = vrot.slane %v1082_v54, 2 }
 0x309   :  { %v1072_v56 = vrot.slane %v1071_v55, 1  ;;  %v1084_v58 = vadd.f32 %v1083_v6, %v1082_v54 }
 0x30b   :  { %v1073_v60 = vadd.f32 %v1072_v56, %v1071_v55  ;;  %v1085_v61 = vrot.slane %v1084_v58, 1 }
 0x30d   :  { %1620 = vmatmul.mubr.f32.vlgmr.msra.gmra.mrb[18].mxu0 %v1073_v60  ;;  %v1086_v63 = vadd.f32 %v1085_v61, %v1084_v58 }
 0x30f   :  { %1655 = vmatmul.mubr.f32.vlgmr.msra.gmra.mrb[10].mxu1 %v1086_v63 }
 0x3e0   :  { %v1153_v59 = vpop.f32.mrb[18].mxu0 }
 0x3e1   :  { %v1157_v0 = vmul.f32 0.001953125, %v1153_v59  ;;  %v1621_v49 = vpop.f32.mrb[19].mxu0 }
 0x3e2   :  { %v1224_v57 = vpop.f32.mrb[10].mxu1 }
 0x3e3   :  { %v1229_v62 = vmul.f32 %v1157_v0, %v1157_v0  ;;  %v1228_v4 = vmul.f32 0.001953125, %v1224_v57  ;;  %v1656_v9 = vpop.f32.mrb[11].mxu1 }
 0x3e5   :  { %v1230_v14 = vsub.f32 %v1228_v4, %v1229_v62 }
 0x3e7   :  { %v1231_v19 = vadd.f32 1e-05, %v1230_v14 }
 0x3e9   :  { %1858 = vrsqrt.f32 %v1231_v19 }
 0x3f3   :  { %v1859_v48 = vpop.eup %1858 }
 0x3f4   :  { %v1234_v15 = vmul.f32 %v1859_v48, %v1233_v51 }
 0x3f6   :  { %v1236_v1 = vmul.f32 %v1234_v15, %v1157_v0  ;;  %v1241_v3 = vrot.slane %v1234_v15, %v2329_v35 }
 0x3f8   :  { %v1237_v22 = vsub.f32 %v1235_v16, %v1236_v1  ;;  %v1242_v52 = vmul.f32 %v1241_v3, %v1061_v33  ;;  %v1243_v5 = vmul.f32 %v1241_v3, %v1062_v18  ;;  %v1244_v7 = vmul.f32 %v1241_v3, %v1063_v27 }
 0x3f9   :  { %v1245_v8 = vmul.f32 %v1241_v3, %v1064_v32 }
 0x3fa   :  { %v1250_v10 = vrot.slane %v1237_v22, %v2329_v35 }
 0x3fc   :  { %v1252_v11 = vadd.f32 %v1250_v10, %v1242_v52  ;;  %v1253_v12 = vadd.f32 %v1250_v10, %v1243_v5  ;;  %v1254_v13 = vadd.f32 %v1250_v10, %v1244_v7  ;;  %v1255_v17 = vadd.f32 %v1250_v10, %v1245_v8 }
 0x3fe   :  { %v1256_v20 = vmax.f32 %v1252_v11, 0.0  ;;  %v1257_v21 = vmax.f32 %v1253_v12, 0.0  ;;  %v1258_v23 = vmax.f32 %v1254_v13, 0.0  ;;  %v1259_v24 = vmax.f32 %v1255_v17, 0.0 }
 0x400   :  { %1260 = vst [vmem:[%s2460_s7] sm:$0xff] %v1256_v20  ;;  %1261 = vst [vmem:[%s2460_s7 + $0x8] sm:$0xff] %v1257_v21 }
 0x401   :  { %1262 = vst [vmem:[%s2460_s7 + $0x10] sm:$0xff] %v1258_v23  ;;  %1263 = vst [vmem:[%s2460_s7 + $0x18] sm:$0xff] %v1259_v24 }
 0x402   :  { %1268 = vsyncpa [#allocation3], 1 }

</bundles_post_ra>
